<compile_context>
chip_gen: v5e
topology: v5e:2x2
jax: 0.10.0
libtpu: 0.0.40
codegen_flags: <defaults>
</compile_context>

<pallas_src>
import math

import jax
import jax.numpy as jnp
from jax.experimental import pallas as pl
from jax.experimental.pallas import tpu as pltpu


# ----------------------------------------------------------------------------
# small helpers
# ----------------------------------------------------------------------------
def _cdiv(a, b):
    return -(-a // b)


def _round_up(x, m):
    return ((x + m - 1) // m) * m


def _sublane(dtype):
    # 8 rows/vreg for 4-byte, 16 for 2-byte, 32 for 1-byte dtypes.
    return max(8, 32 // jnp.dtype(dtype).itemsize)


def _vmem_capacity_bytes():
    cap = 64 * 1024 * 1024  # conservative default (v7x per-TC size)
    try:
        info = pltpu.get_tpu_info()
        cap_attr = int(getattr(info, "vmem_capacity_bytes", 0) or 0)
        if cap_attr > 0:
            cap = cap_attr
    except Exception:
        pass
    return cap


# ----------------------------------------------------------------------------
# kernels
# ----------------------------------------------------------------------------
def _single_tile_n_kernel(x_ref, u_ref, v_ref, b_ref, o_ref):
    # x:(tm,K)  u:(K,R)  v:(R,N)  b:(1,N)  o:(tm,N); grid = (num_i,)
    # u/v/bias have constant block indices -> DMA'd once for the whole grid.
    xu = jnp.dot(x_ref[...], u_ref[...], preferred_element_type=jnp.float32)
    y = jnp.dot(xu, v_ref[...].astype(jnp.float32),
                preferred_element_type=jnp.float32)
    o_ref[...] = (y + b_ref[...].astype(jnp.float32)).astype(o_ref.dtype)


def _make_tiled_n_kernel(v_resident):
    def kernel(x_ref, u_ref, v_ref, b_ref, o_ref, xu_ref):
        # x:(tm,K)  u:(K,R)  o:(tm,tn)  xu:(tm,R) f32 scratch
        # v_resident: v:(num_j,R,tn), b:(num_j,1,tn) with constant block index
        # else:       v:(1,R,tn),     b:(1,1,tn)     streamed per j
        j = pl.program_id(1)

        @pl.when(j == 0)
        def _():
            # First matmul only once per M tile; reused across all N tiles.
            xu_ref[...] = jnp.dot(x_ref[...], u_ref[...],
                                  preferred_element_type=jnp.float32)

        v_blk = v_ref[j] if v_resident else v_ref[0]
        b_blk = b_ref[j] if v_resident else b_ref[0]
        y = jnp.dot(xu_ref[...], v_blk.astype(jnp.float32),
                    preferred_element_type=jnp.float32)
        o_ref[...] = (y + b_blk.astype(jnp.float32)).astype(o_ref.dtype)

    return kernel


# ----------------------------------------------------------------------------
# tile planning (VMEM-budget driven)
# ----------------------------------------------------------------------------
def _plan_tiles(M, K, N, R, x_isz, w_isz, o_isz, budget, sub, tm_hint, tn_hint):
    """Return (tm, tn, num_j, v_resident)."""
    n_lane = _round_up(N, 128)

    def cost(tm, tn, num_j, resident):
        c = 2 * tm * K * x_isz            # x tile, double buffered
        c += 2 * tm * tn * o_isz          # out tile, double buffered
        c += 2 * K * R * w_isz            # u (2 buffers allocated, 1 filled)
        vb = num_j if resident else 1
        c += 2 * vb * R * tn * w_isz      # v
        c += 2 * vb * tn * w_isz          # bias
        if num_j > 1:
            c += tm * R * 4               # f32 xu scratch
        return c

    # --- M tile --------------------------------------------------------------
    if tm_hint is not None:
        tm = max(int(tm_hint), 1)
    else:
        tm = 512 if x_isz <= 2 else 256   # bigger tiles for 2-byte dtypes
    if M <= sub:
        tm = M                            # tiny axis: full (always legal)
    else:
        tm = _round_up(min(tm, M), sub)
        if M >= 2 * sub:                  # >=2 M tiles: feed both v7x cores
            tm = min(tm, _round_up(_cdiv(M, 2), sub))

    # --- N tile --------------------------------------------------------------
    def plan_n(tm_cur):
        # 1) single N tile: no scratch, resident params, fully hidden x DMA.
        if tn_hint is None and cost(tm_cur, n_lane, 1, True) <= budget:
            return (N, 1, True)
        # 2) tiled N with resident (padded) v / bias.
        cands = [int(tn_hint)] if tn_hint is not None else [2048, 1024, 512, 256, 128]
        for tn in cands:
            tn = min(_round_up(max(tn, 128), 128), n_lane)
            if tn >= n_lane and tn_hint is None:
                continue                  # would not beat the single-tile case
            num_j = _cdiv(_round_up(N, tn), tn)
            if num_j > 1 and cost(tm_cur, tn, num_j, True) <= budget:
                return (tn, num_j, True)
        # 3) tiled N, v/bias streamed per tile (huge rank*out_features).
        for tn in (512, 256, 128):
            num_j = _cdiv(_round_up(N, tn), tn)
            if num_j > 1 and cost(tm_cur, tn, num_j, False) <= budget:
                return (tn, num_j, False)
        return None

    plan = None
    while True:
        plan = plan_n(tm)
        if plan is not None or tm <= sub or M <= sub:
            break
        tm = max(sub, _round_up(tm // 2, sub))   # shrink M tile to fit VMEM

    if plan is None:                              # last resort: smallest tiles
        if n_lane > 128:
            tn = 128
            num_j = _cdiv(_round_up(N, tn), tn)
            plan = (tn, num_j, False)
        else:
            plan = (N, 1, True)

    tn, num_j, resident = plan
    return tm, tn, num_j, resident


# ----------------------------------------------------------------------------
# wrapper
# ----------------------------------------------------------------------------
def lowrank_linear(x, u, v, bias, *, tm=None, tn=None, interpret=False):
    """y = x @ u @ v + bias, arbitrary leading dims on x."""
    in_features, rank = u.shape
    rank_v, out_features = v.shape
    assert rank_v == rank and x.shape[-1] == in_features
    assert bias.shape == (out_features,)

    lead_shape = x.shape[:-1]
    x2d = x.reshape(-1, in_features)
    M, K, N, R = x2d.shape[0], in_features, out_features, rank

    out_dtype = x.dtype
    x_isz = jnp.dtype(x.dtype).itemsize
    w_isz = jnp.dtype(u.dtype).itemsize
    o_isz = jnp.dtype(out_dtype).itemsize

    cap = _vmem_capacity_bytes()
    tile_budget = int(cap * 0.70)          # tiles must fit here ...
    vmem_limit = int(cap * 0.85)           # ... compiler limit keeps headroom

    sub = _sublane(x.dtype)
    if tn is not None and int(tn) >= N:
        tn = None                          # full N already a single tile
    tm_eff, tn_eff, num_j, v_resident = _plan_tiles(
        M, K, N, R, x_isz, w_isz, o_isz, tile_budget, sub, tm, tn)

    num_i = _cdiv(M, tm_eff)
    out_shape = jax.ShapeDtypeStruct((M, N), out_dtype)
    cost = pl.CostEstimate(
        flops=2 * M * R * (K + N),
        transcendentals=0,
        bytes_accessed=(x2d.size * x_isz + M * N * o_isz
                        + u.size * w_isz + v.size * w_isz + bias.size * w_isz),
    )
    params = pltpu.CompilerParams(
        dimension_semantics=(("parallel",) if num_j == 1
                             else ("parallel", "arbitrary")),
        vmem_limit_bytes=vmem_limit,
    )

    if num_j == 1:
        grid_spec = pltpu.PrefetchScalarGridSpec(
            num_scalar_prefetch=0,
            grid=(num_i,),
            in_specs=[
                pl.BlockSpec((tm_eff, K), lambda i: (i, 0)),
                pl.BlockSpec((K, R), lambda i: (0, 0)),      # fetched once
                pl.BlockSpec((R, N), lambda i: (0, 0)),      # fetched once
                pl.BlockSpec((1, N), lambda i: (0, 0)),      # fetched once
            ],
            out_specs=pl.BlockSpec((tm_eff, N), lambda i: (i, 0)),
        )
        out = pl.pallas_call(
            _single_tile_n_kernel,
            out_shape=out_shape,
            grid_spec=grid_spec,
            compiler_params=params,
            cost_estimate=cost,
            interpret=interpret,
        )(x2d, u, v, bias.reshape(1, N))
    else:
        # Pad the (tiny) parameters so every N block is full, then lay them out
        # as (num_j, R, tn) / (num_j, 1, tn) so the kernel indexes block j on
        # the leading axis (no dynamic lane slicing, no per-M-tile re-DMA).
        n_pad = num_j * tn_eff
        v_p = v if n_pad == N else jnp.pad(v, ((0, 0), (0, n_pad - N)))
        b_p = bias if n_pad == N else jnp.pad(bias, (0, n_pad - N))
        v_blocks = v_p.reshape(R, num_j, tn_eff).transpose(1, 0, 2)
        b_blocks = b_p.reshape(num_j, 1, tn_eff)

        if v_resident:
            v_spec = pl.BlockSpec((num_j, R, tn_eff), lambda i, j: (0, 0, 0))
            b_spec = pl.BlockSpec((num_j, 1, tn_eff), lambda i, j: (0, 0, 0))
        else:
            v_spec = pl.BlockSpec((1, R, tn_eff), lambda i, j: (j, 0, 0))
            b_spec = pl.BlockSpec((1, 1, tn_eff), lambda i, j: (j, 0, 0))

        grid_spec = pltpu.PrefetchScalarGridSpec(
            num_scalar_prefetch=0,
            grid=(num_i, num_j),
            in_specs=[
                pl.BlockSpec((tm_eff, K), lambda i, j: (i, 0)),
                pl.BlockSpec((K, R), lambda i, j: (0, 0)),
                v_spec,
                b_spec,
            ],
            out_specs=pl.BlockSpec((tm_eff, tn_eff), lambda i, j: (i, j)),
            scratch_shapes=[pltpu.VMEM((tm_eff, R), jnp.float32)],
        )
        out = pl.pallas_call(
            _make_tiled_n_kernel(v_resident),
            out_shape=out_shape,
            grid_spec=grid_spec,
            compiler_params=params,
            cost_estimate=cost,
            interpret=interpret,
        )(x2d, u, v_blocks, b_blocks)

    return out.reshape(*lead_shape, N)


# ----------------------------------------------------------------------------
# init mirroring the PyTorch reset_parameters()
# ----------------------------------------------------------------------------
def init_lowrank_params(key, in_features, out_features, rank, dtype=jnp.float32):
    ku, kv, kb = jax.random.split(key, 3)
    # kaiming_uniform_(tensor, a=sqrt(5)) on 2D: bound = 1/sqrt(fan_in=dim 1)
    u_bound = 1.0 / math.sqrt(rank)           # u: (in_features, rank)
    v_bound = 1.0 / math.sqrt(out_features)   # v: (rank, out_features)
    u = jax.random.uniform(ku, (in_features, rank), dtype, -u_bound, u_bound)
    v = jax.random.uniform(kv, (rank, out_features), dtype, -v_bound, v_bound)
    b_bound = 1.0 / math.sqrt(rank)           # fan_in of u
    bias = jax.random.uniform(kb, (out_features,), dtype, -b_bound, b_bound)
    return u, v, bias


if __name__ == "__main__":
    key = jax.random.PRNGKey(0)
    kx, kp, kx2, kp2 = jax.random.split(key, 4)

    # ---- small f32 check: single-N-tile path, M split across >=2 tiles ------
    batch, seq = 2, 8
    in_features, out_features, rank = 32, 16, 4
    x = jax.random.normal(kx, (batch, seq, in_features), jnp.float32)
    u, v, bias = init_lowrank_params(kp, in_features, out_features, rank)

    y = jax.block_until_ready(lowrank_linear(x, u, v, bias))
    y_ref = x @ (u @ v) + bias
    assert y.shape == (batch, seq, out_features)
    assert jnp.allclose(y, y_ref, atol=1e-4, rtol=1e-4)

    # ---- bf16 check: tiled-N path with resident v/bias + ragged tails -------
    Mb, in2, out2, rank2 = 144, 64, 192, 8
    xb = jax.random.normal(kx2, (Mb, in2), jnp.float32).astype(jnp.bfloat16)
    ub, vb, bb = init_lowrank_params(kp2, in2, out2, rank2, dtype=jnp.bfloat16)

    yb = jax.block_until_ready(lowrank_linear(xb, ub, vb, bb, tm=64, tn=128))
    yb_ref = (xb.astype(jnp.float32)
              @ (ub.astype(jnp.float32) @ vb.astype(jnp.float32))
              + bb.astype(jnp.float32))
    assert yb.shape == (Mb, out2)
    assert jnp.allclose(yb.astype(jnp.float32), yb_ref, atol=5e-2, rtol=5e-2)

    print("KERNEL_OK")
</pallas_src>

<mosaic_0001>
module attributes {stable_mosaic.version = 11 : i64} {
  func.func @_single_tile_n_kernel(%arg0: i32, %arg1: memref<8x32xf32, #tpu.memory_space<vmem>>, %arg2: memref<32x4xf32, #tpu.memory_space<vmem>>, %arg3: memref<4x16xf32, #tpu.memory_space<vmem>>, %arg4: memref<1x16xf32, #tpu.memory_space<vmem>>, %arg5: memref<8x16xf32, #tpu.memory_space<vmem>>) attributes {dimension_semantics = [#tpu.dimension_semantics<parallel>], iteration_bounds = array<i64: 2>, scalar_prefetch = 0 : i64, scratch_operands = 0 : i64, tpu.core_type = #tpu.core_type<tc>, window_params = [{transform_indices = @transform_0, window_bounds = array<i64: 8, 32>}, {pipeline_mode = #tpu.pipeline_mode<synchronous>, transform_indices = @transform_1, window_bounds = array<i64: 32, 4>}, {pipeline_mode = #tpu.pipeline_mode<synchronous>, transform_indices = @transform_2, window_bounds = array<i64: 4, 16>}, {pipeline_mode = #tpu.pipeline_mode<synchronous>, transform_indices = @transform_3, window_bounds = array<i64: 1, 16>}, {transform_indices = @transform_4, window_bounds = array<i64: 8, 16>}]} {
    %c0 = arith.constant 0 : index
    %c0_0 = arith.constant 0 : index
    %0 = vector.load %arg1[%c0, %c0_0] : memref<8x32xf32, #tpu.memory_space<vmem>>, vector<8x32xf32>
    %c0_1 = arith.constant 0 : index
    %c0_2 = arith.constant 0 : index
    %1 = vector.load %arg2[%c0_1, %c0_2] : memref<32x4xf32, #tpu.memory_space<vmem>>, vector<32x4xf32>
    %cst = arith.constant dense<0.000000e+00> : vector<8x4xf32>
    %2 = tpu.matmul %0, %1, %cst {dimension_numbers = #tpu.dot_dimension_numbers<[1], [0], [0], [1], [0, 0, 1, 1], [], []>} : vector<8x32xf32>, vector<32x4xf32>, vector<8x4xf32> -> vector<8x4xf32>
    %c0_3 = arith.constant 0 : index
    %c0_4 = arith.constant 0 : index
    %3 = vector.load %arg3[%c0_3, %c0_4] : memref<4x16xf32, #tpu.memory_space<vmem>>, vector<4x16xf32>
    %cst_5 = arith.constant dense<0.000000e+00> : vector<8x16xf32>
    %4 = tpu.matmul %2, %3, %cst_5 {dimension_numbers = #tpu.dot_dimension_numbers<[1], [0], [0], [1], [0, 0, 1, 1], [], []>} : vector<8x4xf32>, vector<4x16xf32>, vector<8x16xf32> -> vector<8x16xf32>
    %c0_6 = arith.constant 0 : index
    %c0_7 = arith.constant 0 : index
    %5 = vector.load %arg4[%c0_6, %c0_7] : memref<1x16xf32, #tpu.memory_space<vmem>>, vector<1x16xf32>
    %6 = vector.broadcast %5 : vector<1x16xf32> to vector<8x16xf32>
    %7 = arith.addf %4, %6 : vector<8x16xf32>
    %c0_8 = arith.constant 0 : index
    %c0_9 = arith.constant 0 : index
    %8 = vector.load %arg5[%c0_8, %c0_9] : memref<8x16xf32, #tpu.memory_space<vmem>>, vector<8x16xf32>
    tpu.vector_store %arg5[%c0_8, %c0_9], %7 {strides = array<i32>} : memref<8x16xf32, #tpu.memory_space<vmem>>, vector<8x16xf32>,
    return
  }
  func.func @transform_0(%arg0: i32) -> (i32, i32) {
    %c0_i32 = arith.constant 0 : i32
    %c0_i32_0 = arith.constant 0 : i32
    return %arg0, %c0_i32 : i32, i32
  }
  func.func @transform_1(%arg0: i32) -> (i32, i32) {
    %c0_i32 = arith.constant 0 : i32
    %c0_i32_0 = arith.constant 0 : i32
    %c0_i32_1 = arith.constant 0 : i32
    return %c0_i32, %c0_i32_0 : i32, i32
  }
  func.func @transform_2(%arg0: i32) -> (i32, i32) {
    %c0_i32 = arith.constant 0 : i32
    %c0_i32_0 = arith.constant 0 : i32
    %c0_i32_1 = arith.constant 0 : i32
    return %c0_i32, %c0_i32_0 : i32, i32
  }
  func.func @transform_3(%arg0: i32) -> (i32, i32) {
    %c0_i32 = arith.constant 0 : i32
    %c0_i32_0 = arith.constant 0 : i32
    %c0_i32_1 = arith.constant 0 : i32
    return %c0_i32, %c0_i32_0 : i32, i32
  }
  func.func @transform_4(%arg0: i32) -> (i32, i32) {
    %c0_i32 = arith.constant 0 : i32
    %c0_i32_0 = arith.constant 0 : i32
    return %arg0, %c0_i32 : i32, i32
  }
}

</mosaic_0001>

<bundles_post_ra>
// kernel: tpu_custom_call.1
= control target key start
LH: loop header
LB: loop body
LE: loop exit
PB: predicated region body
PF: predicated region fallthrough
CT: control target
= control target key end

     0   :  { %9 = vsyncpa [#allocation3], 0  ;;  %s577_s0 = inlined_call_operand.vmem [shape: f32[16,32], index: 0, kind: input, shape index: {}]   ;;  %s578_s1 = inlined_call_operand.vmem [shape: f32[32,4], index: 1, kind: input, shape index: {}]   ;;  %s579_s2 = inlined_call_operand.vmem [shape: f32[4,16], index: 2, kind: input, shape index: {}]   ;;  %s580_s3 = inlined_call_operand.vmem [shape: f32[1,16], index: 3, kind: input, shape index: {}]   ;;  %s581_s4 = inlined_call_operand.hbm [shape: f32[16,16], index: 4, kind: output, shape index: {}]  }
   0x1   :  { %11 = vsyncpa [#allocation3 + $0x1], 0  ;;  %s474_s15 = smov 0   ;;  %s476_s16 = smov 0  }
   0x2   :  { %s478_s17 = smov 0   ;;  %s480_s18 = smov 0  }
   0x3 LB: > { %s495_s19 = sadd.s32 4294967295, %s447_s18   ;;  %s332_s20 = sadd.s32 4294967294, %s447_s18   ;;  %s447_s18 = sphi %s480_s18, %s587_s18   ;;  %s443_s17 = sphi %s478_s17, %s586_s17   ;;  %s439_s16 = sphi %s476_s16, %s585_s16   ;;  %s435_s15 = sphi %s474_s15, %s584_s15  }
   0x4   : > { %s499_s21 = sadd.s32 1, %s447_s18   ;;  %s113_s22 = sadd.s32 1, %s443_s17 }
   0x5   : > { %s110_s23 = ssub.s32 %s447_s18, %s499_s21  ;;  %p123_p0 = scmp.ne.s32.totalorder %s443_s17, %s439_s16 }
   0x6   : > { %p111_p1 = scmp.eq.s32.totalorder %s110_s23, 0  ;;  %p124_p2 = scmp.eq.s32.totalorder %s495_s19, 1 }
   0x7   : > { %p129_p3 = scmp.ne.s32.totalorder %s439_s16, %s435_s15  ;;  %p130_p4 = scmp.eq.s32.totalorder %s332_s20, 1 }
   0x8   : > { %s510_s24 = scalar_select %p111_p1, %s443_s17, %s113_s22  }
   0x9   : > { %p512_p5 = por %p124_p2, %p123_p0  ;;  %p516_p6 = por %p130_p4, %p129_p3 }
   0xa   : > { %p335_p7 = scmp.ge.s32.totalorder %s447_s18, 1  ;;  %p164_p8 = scmp.lt.s32.totalorder %s447_s18, 3 }
   0xc   : > { %p165_p9 = pnand %p335_p7, %p164_p8 }
   0xd   : > { %p189_p10 = scmp.lt.s32.totalorder (!%p165_p9), %s495_s19, 1  ;;  %s186_s22 = sand.u32 (!%p165_p9), 1, %s439_s16  }
   0xe   : > { %168 = sbr.rel (%p165_p9) target bundleno = 284 (0x11c), region = 36  ;;  %s336_s23 = sshll.u32 (!%p165_p9), %s186_s22, 3 }
   0xf   : > { %s342_s27 = sshll.u32 (!%p165_p9), %s495_s19, 3  ;;  %s405_s14 = scalar_lea.hbm (!%p165_p9), %s581_s4, 16 }
  0x10   : > { %s268_s30 = scalar_lea.hbm (!%p165_p9), %s581_s4, %s342_s27 }
  0x11   : > { %s272_s9 = sshll.u32 (!%p165_p9), %s268_s30, 4  ;;  %s273_s9 = int_to_ptr.hbm [resolvable:$true] %s272_s9 }
  0x13   : > { %v197_v0 = vld [vmem:[%s578_s1 + $0x18] sm:$0xff]  ;;  %v196_v1 = vld [vmem:[%s578_s1 + $0x10] sm:$0xff]  ;;  %v195_v2 = vld [vmem:[%s578_s1 + $0x8] sm:$0xff]  ;;  %s190_s7 = scalar_select %p189_p10, %s495_s19, 1  ;;  %vm198_vm0 = vcmask 261120   ;;  %vm231_vm1 = vcmask 1043456  }
  0x14   : > { %214 = vmatpush.msra.mxu0 %v197_v0  ;;  %v194_v3 = vld [vmem:[%s578_s1] sm:$0xff]  ;;  %vm227_vm2 = vcmask 31744   ;;  %vm255_vm3 = vcmask 130048   ;;  %s399_s19 = sshra.s32 %s273_s9, 4  ;;  %s400_s19 = int_to_ptr.hbm [resolvable:$true] %s399_s19 }
  0x15   : > { %s337_s10 = sshll.u32 %s190_s7, 3  ;;  %v222_v5 = vld [vmem:[%s579_s2] sm:$0xf]  ;;  %s188_s7 = scalar_lea.vmem [#allocation2], %s336_s23 }
  0x16   : > { %215 = vmatpush.msra.mxu0 %v196_v1  ;;  %s192_s13 = scalar_lea.vmem %s577_s0, %s337_s10  ;;  %339 = vmatpush.msk.msra.mxu1 %vm231_vm1, %v222_v5  ;;  %v384_v7 = vld [vmem:[%s580_s3] ss:$0 sm:$0xff]  ;;  %s270_s8 = sshll.u32 %s188_s7, 4  ;;  %s271_s8 = int_to_ptr.vmem [resolvable:$true] %s270_s8 }
  0x17   : > { %v193_v4 = vld [vmem:[%s192_s13] sm:$0xff]  ;;  %s258_s10 = scalar_lea.sflag [#allocation3], %s186_s22  ;;  %s401_s11 = scalar_lea.hbm %s400_s19, 8 }
  0x18   : > { %216 = vmatpush.msra.mxu0 %v195_v2  ;;  %p402_p11 = scmp.ne.s32.totalorder %s400_s19, %s401_s11  ;;  %p406_p0 = scmp.lt.s32.totalorder %s400_s19, %s581_s4 }
  0x19   : > { %p407_p1 = scmp.lt.s32.totalorder %s405_s14, %s401_s11 }
  0x1a   : > { %217 = vmatpush.msra.mxu0 %v194_v3  ;;  %p403_p12 = pnand %p402_p11, %p512_p5 }
  0x1b   : > { %338 = vmatmul.msk.f32.vlgmr.msra.gmra.mxu0 %vm198_vm0, %v193_v4  ;;  %p408_p2 = por %p407_p1, %p406_p0 }
  0x1c   : > { %p404_p13 = pneg %p403_p12 }
  0x1e   : > { %p409_p3 = pnand %p408_p2, %p404_p13 }
  0x98   : > { %v219_v6 = vpop.f32.mrf.mxu0 }
  0x99   : > { %340 = vmatmul.msk.f32.vlgmr.msra.gmra.mxu1 %vm227_vm2, %v219_v6 }
 0x116   : > { %v252_v8 = vpop.f32.mrf.mxu1 }
 0x117   : > { %v253_v9 = vadd.f32 %v384_v7, %v252_v8 }
 0x119   : > { %256 = vst.msk [vmem:[%s188_s7] sm:$0xff] %vm255_vm3, %v253_v9 }
 0x11a   : > { %412 = shalt.err (!%p409_p3)
}
 0x11b   : > { %345 = dma.vmem_to_hbm [thread:$0]  (%p512_p5), %s271_s8, 128, %s273_s9, %s258_s10  }
 0x11c PF: > { %p351_p4 = scmp.ge.s32.totalorder %s447_s18, 2  ;;  %s284_s22 = sand.u32 1, %s435_s15  }
 0x11d   : > { %s285_s27 = scalar_lea.sflag [#allocation3], %s284_s22 }
 0x11e   : > { %p348_p7 = pnand %p351_p4, %p516_p6 }
 0x120   : > { %p349_p8 = pneg %p348_p7 }
 0x122   : > { %430 = dma.done.wait (%p349_p8), %s285_s27, 128  }
 0x123   : > { %432 = vsyncadd (%p349_p8), %s285_s27, 4294967168  ;;  %p14_p9 = scmp.ge.s32.totalorder %s499_s21, 4   ;;  %s584_s15 = smov %s439_s16 }
 0x124   : > { %s585_s16 = smov %s443_s17  ;;  %s586_s17 = smov %s510_s24 }
 0x125   : > { %s587_s18 = smov %s499_s21  ;;  %16 = sbr.rel (!%p14_p9) target bundleno = 3 (0x3), region = 71 }
 0x12a   :  { %291 = vsyncpa [#allocation3], 1 }
 0x12b   :  { %293 = vsyncpa [#allocation3 + $0x1], 1 }

</bundles_post_ra>
